<compile_context>
chip_gen: v7x
topology: tpu7x:2x2x1
jax: 0.10.0
libtpu: 0.0.40
codegen_flags: <defaults>
</compile_context>

<pallas_src>
import numpy as np
import jax
import jax.numpy as jnp
from jax.experimental import pallas as pl
from jax.experimental.pallas import tpu as pltpu

LANE = 128  # lane width; classifier output is padded to this for dense stores


def gcn_kernel(a_ref, h0_ref, mats_ref, vecs_ref, out_ref):
    """One grid step = one graph of the batch.

    a_ref    : (n, n)        normalized per-graph adjacency A_hat
    h0_ref   : (n, 1)        in-degree input feature
    mats_ref : (2H, 128)     rows [0:H, 0:H] = W2, rows [H:2H, :] = Wc zero-padded to 128 lanes
    vecs_ref : (8, 128)      row 0 = w1, row 1 = b1, row 2 = b2, row 3 = bc (lane-padded)
    out_ref  : (1, 128)      lane-dense padded classifier output row for this graph
    """
    H = mats_ref.shape[0] // 2

    a = a_ref[...]                       # (n, n)
    h0 = h0_ref[...]                     # (n, 1)
    w1 = vecs_ref[0:1, 0:H]              # (1, H)
    b1 = vecs_ref[1:2, 0:H]              # (1, H)
    b2 = vecs_ref[2:3, 0:H]              # (1, H)
    bc = vecs_ref[3:4, :]                # (1, 128)  (zeros beyond n_classes)
    w2 = mats_ref[0:H, 0:H]              # (H, H)
    wc = mats_ref[H:2 * H, :]            # (H, 128)  (zeros beyond n_classes)

    # GraphConv 1: rank-1 projection on the VPU, then ONE wide MXU matmul.
    # (A @ h0) @ w1 == A @ (h0 * w1) by associativity.
    x1 = h0 * w1                                                           # (n, H) VPU
    h1 = jnp.maximum(jnp.dot(a, x1, preferred_element_type=jnp.float32) + b1, 0.0)

    # GraphConv 2: aggregate then project.
    agg2 = jnp.dot(a, h1, preferred_element_type=jnp.float32)              # (n, H)
    h2 = jnp.maximum(jnp.dot(agg2, w2, preferred_element_type=jnp.float32) + b2, 0.0)

    # dgl.mean_nodes: per-graph mean over the node (sublane) axis -> XLU reduction.
    hg = jnp.mean(h2, axis=0, keepdims=True)                               # (1, H)

    # Classifier (nn.Linear), lane-dense 128-wide padded store.
    out_ref[...] = jnp.dot(hg, wc, preferred_element_type=jnp.float32) + bc


def pack_params(w1, b1, w2, b2, wc, bc):
    """Pack the 6 tiny parameter tensors into 2 lane-dense VMEM slabs."""
    H = w2.shape[0]
    C = wc.shape[1]
    mats = jnp.zeros((2 * H, LANE), jnp.float32)
    mats = mats.at[0:H, 0:H].set(w2)
    mats = mats.at[H:2 * H, 0:C].set(wc)
    vecs = jnp.zeros((8, LANE), jnp.float32)
    vecs = vecs.at[0, 0:H].set(w1[0])
    vecs = vecs.at[1, 0:H].set(b1[0])
    vecs = vecs.at[2, 0:H].set(b2[0])
    vecs = vecs.at[3, 0:C].set(bc[0])
    return mats, vecs


def gcn_classifier_forward(a_blocks, h0_blocks, w1, b1, w2, b2, wc, bc):
    """a_blocks: (G, n, n) per-graph normalized adjacency; h0_blocks: (G, n, 1)."""
    G, n, _ = a_blocks.shape
    H = w2.shape[0]
    C = wc.shape[1]
    mats, vecs = pack_params(w1, b1, w2, b2, wc, bc)

    out_padded = pl.pallas_call(
        gcn_kernel,
        out_shape=jax.ShapeDtypeStruct((G, 1, LANE), jnp.float32),
        grid=(G,),
        in_specs=[
            pl.BlockSpec((None, n, n), lambda g: (g, 0, 0)),   # per-graph adjacency
            pl.BlockSpec((None, n, 1), lambda g: (g, 0, 0)),   # per-graph in-degree feature
            pl.BlockSpec((2 * H, LANE), lambda g: (0, 0)),     # packed matrices (reused)
            pl.BlockSpec((8, LANE), lambda g: (0, 0)),         # packed vectors  (reused)
        ],
        out_specs=pl.BlockSpec((None, 1, LANE), lambda g: (g, 0, 0)),
        compiler_params=pltpu.CompilerParams(
            dimension_semantics=("parallel",),                 # megacore on v7x; free elsewhere
        ),
    )(a_blocks, h0_blocks, mats, vecs)

    return out_padded.reshape(G, LANE)[:, :C]


def build_batched_graph_blocks(key, nodes_per_graph, num_graphs, edges_per_graph):
    """Deterministic batched directed multigraph as block-diagonal per-graph blocks.

    Returns (A_hat_blocks (G,n,n), in_degree_features (G,n,1)).
    """
    n, G = nodes_per_graph, num_graphs
    a = np.zeros((G, n, n), dtype=np.float32)   # a[g, dst, src] = edge multiplicity
    for g in range(G):
        key, k_src, k_dst = jax.random.split(key, 3)
        src = np.asarray(jax.random.randint(k_src, (edges_per_graph,), 0, n))
        dst = np.asarray(jax.random.randint(k_dst, (edges_per_graph,), 0, n))
        for s, d in zip(src, dst):
            a[g, d, s] += 1.0                   # multigraph: duplicate edges accumulate

    in_deg = a.sum(axis=2)                      # (G, n) in-degree of dst nodes
    out_deg = a.sum(axis=1)                     # (G, n) out-degree of src nodes
    # DGL norm='both': clamp degrees to >= 1
    d_dst = np.clip(in_deg, 1.0, None) ** -0.5
    d_src = np.clip(out_deg, 1.0, None) ** -0.5
    a_hat = (d_dst[:, :, None] * a * d_src[:, None, :]).astype(np.float32)
    h0 = in_deg[..., None].astype(np.float32)   # g.in_degrees().view(-1,1).float()
    return jnp.asarray(a_hat), jnp.asarray(h0)


def reference_forward(a_hat, h0, w1, b1, w2, b2, wc, bc):
    """Plain-JAX reference on the same block-diagonal data (DGL math order)."""
    agg1 = jnp.einsum('gij,gjk->gik', a_hat, h0)          # (G, n, 1)
    h1 = jnp.maximum(agg1 @ w1 + b1, 0.0)                 # (G, n, H)
    agg2 = jnp.einsum('gij,gjh->gih', a_hat, h1)          # (G, n, H)
    h2 = jnp.maximum(agg2 @ w2 + b2, 0.0)                 # (G, n, H)
    hg = h2.mean(axis=1)                                  # (G, H)  == dgl.mean_nodes
    return hg @ wc + bc                                   # (G, C)


if __name__ == "__main__":
    key = jax.random.PRNGKey(0)

    # Module-consistent small sizes: in_dim=1 (degree feature), hidden=32, n_classes=4.
    nodes_per_graph, num_graphs, edges_per_graph = 16, 4, 40
    in_dim, hidden_dim, n_classes = 1, 32, 4

    k_graph, k_w1, k_w2, k_wc, k_bc = jax.random.split(key, 5)
    a_hat, h0 = build_batched_graph_blocks(
        k_graph, nodes_per_graph, num_graphs, edges_per_graph)

    def glorot(k, shape):
        fan_in, fan_out = shape
        lim = float(np.sqrt(6.0 / (fan_in + fan_out)))
        return jax.random.uniform(k, shape, jnp.float32, -lim, lim)

    # GraphConv: xavier-uniform weight, zero bias (DGL defaults).
    w1 = glorot(k_w1, (in_dim, hidden_dim))
    b1 = jnp.zeros((1, hidden_dim), jnp.float32)
    w2 = glorot(k_w2, (hidden_dim, hidden_dim))
    b2 = jnp.zeros((1, hidden_dim), jnp.float32)
    # nn.Linear(hidden, n_classes): weight (C, H) applied as x @ W^T; pass W^T directly.
    wc = glorot(k_wc, (hidden_dim, n_classes))
    bc = 0.1 * jax.random.normal(k_bc, (1, n_classes), jnp.float32)

    out = gcn_classifier_forward(a_hat, h0, w1, b1, w2, b2, wc, bc)
    out = jax.block_until_ready(out)

    ref = reference_forward(a_hat, h0, w1, b1, w2, b2, wc, bc)
    assert out.shape == (num_graphs, n_classes)
    np.testing.assert_allclose(np.asarray(out), np.asarray(ref), rtol=1e-5, atol=1e-5)

    print("KERNEL_OK")
</pallas_src>

<mosaic_0001>
module attributes {stable_mosaic.version = 11 : i64} {
  func.func @gcn_kernel(%arg0: i32, %arg1: memref<1x16x16xf32, #tpu.memory_space<vmem>>, %arg2: memref<1x16x1xf32, #tpu.memory_space<vmem>>, %arg3: memref<64x128xf32, #tpu.memory_space<vmem>>, %arg4: memref<8x128xf32, #tpu.memory_space<vmem>>, %arg5: memref<1x1x128xf32, #tpu.memory_space<vmem>>) attributes {dimension_semantics = [#tpu.dimension_semantics<parallel>], iteration_bounds = array<i64: 4>, scalar_prefetch = 0 : i64, scratch_operands = 0 : i64, tpu.core_type = #tpu.core_type<tc>, window_params = [{transform_indices = @transform_0, window_bounds = array<i64: 1, 16, 16>}, {transform_indices = @transform_1, window_bounds = array<i64: 1, 16, 1>}, {pipeline_mode = #tpu.pipeline_mode<synchronous>, transform_indices = @transform_2, window_bounds = array<i64: 64, 128>}, {pipeline_mode = #tpu.pipeline_mode<synchronous>, transform_indices = @transform_3, window_bounds = array<i64: 8, 128>}, {transform_indices = @transform_4, window_bounds = array<i64: 1, 1, 128>}]} {
    %c0 = arith.constant 0 : index
    %c0_0 = arith.constant 0 : index
    %c0_1 = arith.constant 0 : index
    %0 = vector.load %arg1[%c0, %c0_0, %c0_1] : memref<1x16x16xf32, #tpu.memory_space<vmem>>, vector<1x16x16xf32>
    %1 = vector.shape_cast %0 : vector<1x16x16xf32> to vector<16x16xf32>
    %c0_2 = arith.constant 0 : index
    %c0_3 = arith.constant 0 : index
    %c0_4 = arith.constant 0 : index
    %2 = vector.load %arg2[%c0_2, %c0_3, %c0_4] : memref<1x16x1xf32, #tpu.memory_space<vmem>>, vector<1x16x1xf32>
    %3 = vector.shape_cast %2 : vector<1x16x1xf32> to vector<16x1xf32>
    %c0_5 = arith.constant 0 : index
    %c0_6 = arith.constant 0 : index
    %4 = vector.load %arg4[%c0_5, %c0_6] : memref<8x128xf32, #tpu.memory_space<vmem>>, vector<1x32xf32>
    %c1 = arith.constant 1 : index
    %c0_7 = arith.constant 0 : index
    %5 = vector.load %arg4[%c1, %c0_7] : memref<8x128xf32, #tpu.memory_space<vmem>>, vector<1x32xf32>
    %c2 = arith.constant 2 : index
    %c0_8 = arith.constant 0 : index
    %6 = vector.load %arg4[%c2, %c0_8] : memref<8x128xf32, #tpu.memory_space<vmem>>, vector<1x32xf32>
    %c3 = arith.constant 3 : index
    %c0_9 = arith.constant 0 : index
    %7 = vector.load %arg4[%c3, %c0_9] : memref<8x128xf32, #tpu.memory_space<vmem>>, vector<1x128xf32>
    %c0_10 = arith.constant 0 : index
    %c0_11 = arith.constant 0 : index
    %8 = vector.load %arg3[%c0_10, %c0_11] : memref<64x128xf32, #tpu.memory_space<vmem>>, vector<32x32xf32>
    %c32 = arith.constant 32 : index
    %c0_12 = arith.constant 0 : index
    %9 = vector.load %arg3[%c32, %c0_12] : memref<64x128xf32, #tpu.memory_space<vmem>>, vector<32x128xf32>
    %10 = vector.broadcast %3 : vector<16x1xf32> to vector<16x32xf32>
    %11 = vector.broadcast %4 : vector<1x32xf32> to vector<16x32xf32>
    %12 = arith.mulf %10, %11 : vector<16x32xf32>
    %cst = arith.constant dense<0.000000e+00> : vector<16x32xf32>
    %13 = tpu.matmul %1, %12, %cst {dimension_numbers = #tpu.dot_dimension_numbers<[1], [0], [0], [1], [0, 0, 1, 1], [], []>} : vector<16x16xf32>, vector<16x32xf32>, vector<16x32xf32> -> vector<16x32xf32>
    %14 = vector.broadcast %5 : vector<1x32xf32> to vector<16x32xf32>
    %15 = arith.addf %13, %14 : vector<16x32xf32>
    %cst_13 = arith.constant 0.000000e+00 : f32
    %16 = vector.broadcast %cst_13 : f32 to vector<16x32xf32>
    %17 = arith.maximumf %15, %16 : vector<16x32xf32>
    %cst_14 = arith.constant dense<0.000000e+00> : vector<16x32xf32>
    %18 = tpu.matmul %1, %17, %cst_14 {dimension_numbers = #tpu.dot_dimension_numbers<[1], [0], [0], [1], [0, 0, 1, 1], [], []>} : vector<16x16xf32>, vector<16x32xf32>, vector<16x32xf32> -> vector<16x32xf32>
    %cst_15 = arith.constant dense<0.000000e+00> : vector<16x32xf32>
    %19 = tpu.matmul %18, %8, %cst_15 {dimension_numbers = #tpu.dot_dimension_numbers<[1], [0], [0], [1], [0, 0, 1, 1], [], []>} : vector<16x32xf32>, vector<32x32xf32>, vector<16x32xf32> -> vector<16x32xf32>
    %20 = vector.broadcast %6 : vector<1x32xf32> to vector<16x32xf32>
    %21 = arith.addf %19, %20 : vector<16x32xf32>
    %cst_16 = arith.constant 0.000000e+00 : f32
    %22 = vector.broadcast %cst_16 : f32 to vector<16x32xf32>
    %23 = arith.maximumf %21, %22 : vector<16x32xf32>
    %cst_17 = arith.constant dense<0.000000e+00> : vector<32xf32>
    %24 = vector.multi_reduction <add>, %23, %cst_17 [0] : vector<16x32xf32> to vector<32xf32>
    %25 = vector.shape_cast %24 : vector<32xf32> to vector<1x32xf32>
    %cst_18 = arith.constant 1.600000e+01 : f32
    %26 = vector.broadcast %cst_18 : f32 to vector<1x32xf32>
    %27 = arith.divf %25, %26 : vector<1x32xf32>
    %cst_19 = arith.constant dense<0.000000e+00> : vector<1x128xf32>
    %28 = tpu.matmul %27, %9, %cst_19 {dimension_numbers = #tpu.dot_dimension_numbers<[1], [0], [0], [1], [0, 0, 1, 1], [], []>} : vector<1x32xf32>, vector<32x128xf32>, vector<1x128xf32> -> vector<1x128xf32>
    %29 = arith.addf %28, %7 : vector<1x128xf32>
    %c0_20 = arith.constant 0 : index
    %c0_21 = arith.constant 0 : index
    %c0_22 = arith.constant 0 : index
    %30 = vector.load %arg5[%c0_20, %c0_21, %c0_22] : memref<1x1x128xf32, #tpu.memory_space<vmem>>, vector<1x1x128xf32>
    %31 = vector.shape_cast %30 : vector<1x1x128xf32> to vector<1x128xf32>
    %32 = vector.shape_cast %29 : vector<1x128xf32> to vector<1x1x128xf32>
    tpu.vector_store %arg5[%c0_20, %c0_21, %c0_22], %32 {strides = array<i32>} : memref<1x1x128xf32, #tpu.memory_space<vmem>>, vector<1x1x128xf32>,
    return
  }
  func.func @transform_0(%arg0: i32) -> (i32, i32, i32) {
    %c0_i32 = arith.constant 0 : i32
    %c0_i32_0 = arith.constant 0 : i32
    %c0_i32_1 = arith.constant 0 : i32
    return %arg0, %c0_i32, %c0_i32_0 : i32, i32, i32
  }
  func.func @transform_1(%arg0: i32) -> (i32, i32, i32) {
    %c0_i32 = arith.constant 0 : i32
    %c0_i32_0 = arith.constant 0 : i32
    %c0_i32_1 = arith.constant 0 : i32
    return %arg0, %c0_i32, %c0_i32_0 : i32, i32, i32
  }
  func.func @transform_2(%arg0: i32) -> (i32, i32) {
    %c0_i32 = arith.constant 0 : i32
    %c0_i32_0 = arith.constant 0 : i32
    %c0_i32_1 = arith.constant 0 : i32
    return %c0_i32, %c0_i32_0 : i32, i32
  }
  func.func @transform_3(%arg0: i32) -> (i32, i32) {
    %c0_i32 = arith.constant 0 : i32
    %c0_i32_0 = arith.constant 0 : i32
    %c0_i32_1 = arith.constant 0 : i32
    return %c0_i32, %c0_i32_0 : i32, i32
  }
  func.func @transform_4(%arg0: i32) -> (i32, i32, i32) {
    %c0_i32 = arith.constant 0 : i32
    %c0_i32_0 = arith.constant 0 : i32
    %c0_i32_1 = arith.constant 0 : i32
    return %arg0, %c0_i32, %c0_i32_0 : i32, i32, i32
  }
}

</mosaic_0001>

<bundles_post_ra>
// kernel: tpu_custom_call.1
= control target key start
LH: loop header
LB: loop body
LE: loop exit
PB: predicated region body
PF: predicated region fallthrough
CT: control target
= control target key end

     0   :  { %9 = vsyncpa [#allocation3], 0  ;;  %s1137_s0 = inlined_call_operand.vmem [shape: f32[4,16,16], index: 0, kind: input, shape index: {}]   ;;  %s1138_s1 = inlined_call_operand.vmem [shape: f32[4,16,1], index: 1, kind: input, shape index: {}]   ;;  %s1139_s2 = inlined_call_operand.hbm [shape: f32[64,128], index: 2, kind: input, shape index: {}]   ;;  %s1140_s3 = inlined_call_operand.vmem [shape: f32[8,128], index: 3, kind: input, shape index: {}]   ;;  %s1141_s4 = inlined_call_operand.hbm [shape: f32[4,1,128], index: 4, kind: output, shape index: {}]  }
   0x1   :  { %10 = vsyncpa [#allocation4], 0 }
   0x2   :  { %12 = vsyncpa [#allocation4 + $0x1], 0  ;;  %s978_s15 = smov 0   ;;  %s980_s16 = smov 0  }
   0x3   :  { %s982_s17 = smov 0   ;;  %s984_s18 = smov 0  }
   0x4 LB: > { %s999_s19 = sadd.s32 4294967295, %s943_s18   ;;  %s690_s20 = sadd.s32 4294967294, %s943_s18   ;;  %s943_s18 = sphi %s984_s18, %s1157_s18   ;;  %s939_s17 = sphi %s982_s17, %s1156_s17   ;;  %s935_s16 = sphi %s980_s16, %s1155_s16   ;;  %s931_s15 = sphi %s978_s15, %s1154_s15  }
   0x5   : > { %s1003_s21 = sadd.s32 1, %s943_s18   ;;  %s119_s22 = sadd.s32 1, %s939_s17 }
   0x6   : > { %s116_s23 = ssub.s32 %s943_s18, %s1003_s21  ;;  %p129_p0 = scmp.ne.s32.totalorder %s939_s17, %s935_s16 }
   0x7   : > { %p117_p1 = scmp.eq.s32.totalorder %s116_s23, 0  ;;  %p130_p2 = scmp.eq.s32.totalorder %s999_s19, 3 }
   0x8   : > { %p135_p3 = scmp.ne.s32.totalorder %s935_s16, %s931_s15  ;;  %p136_p4 = scmp.eq.s32.totalorder %s690_s20, 3 }
   0x9   : > { %s1014_s24 = scalar_select %p117_p1, %s939_s17, %s119_s22  }
   0xa   : > { %p1016_p5 = por %p130_p2, %p129_p0  ;;  %p1020_p6 = por %p136_p4, %p135_p3 }
   0xb   : > { %p691_p7 = scmp.ge.s32.totalorder %s943_s18, 1  ;;  %p143_p8 = scmp.lt.s32.totalorder %s943_s18, 5 }
   0xc   : > { %s1145_s25 = scalar_select %p1016_p5, 1, 0 }
   0xd   : > { %s1146_s26 = scalar_select %p1020_p6, 1, 0 }
   0xe   : > { %p1142_p9 = scmp.eq.s32.totalorder %s999_s19, 0  ;;  %p1027_p10 = pnand %p691_p7, %p143_p8 }
   0xf   : > { %s945_s28 = smov [#allocation2]   ;;  %s849_s7 = scalar_lea.hbm %s1139_s2, 1024 }
  0x10   : > { %s1147_s27 = scalar_select %p1027_p10, 1, 0 }
  0x11   : > { %s155_s29 = sshll.u32 %s945_s28, 4  ;;  %p798_p11 = pneg %p1027_p10  ;;  %s156_s29 = int_to_ptr.vmem [resolvable:$true] %s155_s29 }
  0x12   : > { %p850_p13 = scmp.ne.s32.totalorder %s1139_s2, %s849_s7  ;;  %p856_p3 = scmp.lt.u32.totalorder %s849_s7, %s1139_s2 }
  0x13   : > { %p1035_p12 = pnand %p1142_p9, %p798_p11 }
  0x15   : > { %p851_p0 = pneg %p1035_p12 }
  0x17   : > { %p852_p1 = pnand %p851_p0, %p850_p13 }
  0x19   : > { %p853_p2 = pneg %p852_p1 }
  0x1b   : > { %p858_p4 = pnand %p856_p3, %p853_p2 }
  0x1d   : > { %861 = shalt.err (!%p858_p4)
}
  0x1e   : > { %s862_s12 = scalar_lea.vmem %s156_s29, 1024  ;;  %p870_p9 = scmp.lt.s32.totalorder %s156_s29, %s156_s29 }
  0x1f   : > { %p863_p7 = scmp.ne.s32.totalorder %s156_s29, %s862_s12  ;;  %p871_p6 = scmp.lt.s32.totalorder %s862_s12, %s862_s12 }
  0x21   : > { %p865_p8 = pnand %p863_p7, %p851_p0  ;;  %p872_p5 = por %p871_p6, %p870_p9 }
  0x23   : > { %p866_p11 = pneg %p865_p8 }
  0x25   : > { %p873_p10 = pnand %p872_p5, %p866_p11 }
  0x27   : > { %876 = shalt.err (!%p873_p10)
}
  0x28   : > { %s946_s13 = smov 128   ;;  %s947_s14 = smov 8  }
  0x29   : > { %801 = dma.hbm_to_vmem [thread:$0]  (!%p1035_p12), %s1139_s2, 1024, %s156_s29, [#allocation3], %s946_s13, %s946_s13, %s947_s14  }
  0x2a   : > { %p1149_p13 = scmp.ne.s32.totalorder %s1147_s27, 0 }
  0x2b   : > { %p1150_p1 = scmp.eq.s32.totalorder (!%p1149_p13), %s999_s19, 0 }
  0x2c   : > { %190 = sbr.rel (%p1149_p13) target bundleno = 1098 (0x44a), region = 36 }
  0x33   : > { %922 = dma.done.wait (%p1150_p1), [#allocation3], 1024   ;;  %p1151_p0 = pmov %p1150_p1 }
  0x34   : > { %p220_p5 = scmp.lt.s32.totalorder %s999_s19, 3  ;;  %v948_v0 = vmov 0   ;;  %vm266_vm0 = vcmask 130048   ;;  %v700_v5 = vld [vmem:[%s1140_s3] ss:$0 sm:$0xff]  ;;  %v239_v12 = vld [vmem:[#allocation2 + $0x8] sm:$0xff] }
  0x35   : > { %924 = vsyncadd (%p1151_p0), [#allocation3], 4294966272  ;;  %848 = vset.pattern.permute.xlu0 %v948_v0  ;;  %v238_v11 = vld [vmem:[#allocation2] sm:$0xff]  ;;  %v240_v13 = vld [vmem:[#allocation2 + $0x10] sm:$0xff]  ;;  %vm429_vm1 = vcmask 261120   ;;  %v949_v30 = vmov 0.0|0.0  }
  0x36   : > { %s221_s23 = scalar_select %p220_p5, %s999_s19, 3  ;;  %v778_v14 = vpack.c.bf16 %v239_v12, %v238_v11  ;;  %v241_v15 = vld [vmem:[#allocation2 + $0x18] sm:$0xff]  ;;  %v701_v17 = vld [vmem:[%s1140_s3 + $0x1] ss:$0 sm:$0xff]  ;;  %v243_v28 = vld [vmem:[#allocation2 + $0x28] sm:$0xff]  ;;  %vm950_vm2 = vmmov 0  }
  0x37   : > { %v782_v16 = vpack.c.bf16 %v241_v15, %v240_v13  ;;  %v242_v27 = vld [vmem:[#allocation2 + $0x20] sm:$0xff]  ;;  %v244_v31 = vld [vmem:[#allocation2 + $0x30] sm:$0xff]  ;;  %v245_v32 = vld [vmem:[#allocation2 + $0x38] sm:$0xff]  ;;  %v951_v34 = vmov 0.0   ;;  %s218_s14 = sand.u32 1, %s935_s16   ;;  %p1152_p9 = scmp.ne.s32.totalorder %s1145_s25, 0 }
  0x38   : > { %s713_s28 = sshll.u32 %s221_s23, 4  ;;  %v787_v29 = vpack.c.bf16 %v243_v28, %v242_v27  ;;  %v790_v33 = vpack.c.bf16 %v245_v32, %v244_v31  ;;  %v706_v35 = vld [vmem:[%s1140_s3 + $0x2] ss:$0 sm:$0xff]  ;;  %v237_v52 = vld [vmem:[%s1140_s3 + $0x3] sm:$0x1]  ;;  %s710_s23 = sshll.u32 %s999_s19, 4 }
  0x39   : > { %s229_s29 = scalar_lea.vmem %s1138_s1, %s713_s28  ;;  %s224_s7 = scalar_lea.vmem %s1137_s0, %s713_s28 }
  0x3a   : > { %v232_v1 = vld [vmem:[%s229_s29] sm:$0xff]  ;;  %v233_v2 = vld [vmem:[%s229_s29 + $0x8] sm:$0xff]  ;;  %s219_s28 = scalar_lea.vmem [#allocation5], %s218_s14  ;;  %s1095_s27 = scalar_lea.hbm %s1141_s4, %s710_s23 }
  0x3b   : > { %248 = vperm.xlu0 %848, %v232_v1   ;;  %v230_v3 = vld [vmem:[%s224_s7] sm:$0xff]  ;;  %v231_v10 = vld [vmem:[%s224_s7 + $0x8] sm:$0xff]  ;;  %s611_s30 = sshll.u32 %s219_s28, 4  ;;  %s599_s6 = scalar_lea.sflag [#allocation4], %s218_s14  ;;  %s1097_s30 = int_to_ptr.vmem [resolvable:$true] %s611_s30 }
  0x3c   : > { %738 = vmatprep.mubr.msk.f32.mxu0 %vm266_vm0, %v230_v3  ;;  %745 = vmatprep.mubr.msk.f32.mxu1 %vm266_vm0, %v230_v3  ;;  %s877_s7 = scalar_lea.vmem %s1097_s30, 16  ;;  %s952_s19 = smov [#allocation5]  }
  0x3d   : > { %p878_p6 = scmp.ne.s32.totalorder %s1097_s30, %s877_s7  ;;  %s881_s8 = sshll.u32 %s952_s19, 4  ;;  %s882_s8 = int_to_ptr.vmem [resolvable:$false] %s881_s8 }
  0x3e   : > { %s883_s9 = scalar_lea.vmem %s882_s8, 32  ;;  %p884_p2 = scmp.lt.s32.totalorder %s1097_s30, %s882_s8 }
  0x3f   : > { %253 = vperm.xlu0 %848, %v233_v2   ;;  %p879_p10 = pnand %p878_p6, %p1152_p9  ;;  %p885_p3 = scmp.lt.s32.totalorder %s883_s9, %s877_s7 }
  0x41   : > { %p880_p12 = pneg %p879_p10  ;;  %p886_p4 = por %p885_p3, %p884_p2 }
  0x43   : > { %p887_p7 = pnand %p886_p4, %p880_p12 }
  0xba   : > { %v249_v4 = vpop.permute.xlu0 %248 }
  0xbb   : > { %v260_v7 = vmul.f32 %v700_v5, %v249_v4 }
  0xbe   : > { %v254_v6 = vpop.permute.xlu0 %253 }
  0xbf   : > { %v261_v8 = vmul.f32 %v700_v5, %v254_v6 }
  0xc1   : > { %v770_v9 = vpack.c.bf16 %v261_v8, %v260_v7 }
  0xc3   : > { %771 = vmatprep.subr.bf16.mxu0 %v770_v9 }
  0xc4   : > { %773 = vmatpush3.bf16.msra.mxu0 %v770_v9 }
  0xc5   : > { %779 = vmatprep.subr.bf16.mxu0 %v778_v14 }
  0xc7   : > { %739 = vmatmul.mubr.msk.f32.vlgmr.msra.gmra.mrb[0].mxu0 %vm266_vm0, %v231_v10 }
  0xc8   : > { %781 = vmatpush3.bf16.msra.mxu0 %v778_v14 }
  0xc9   : > { %783 = vmatprep.subr.bf16.mxu0 %v782_v16 }
  0xcc   : > { %785 = vmatpush3.bf16.msra.mxu0 %v782_v16 }
 0x19a   : > { %v740_v18 = vpop.f32.mrb[0].mxu0 }
 0x19b   : > { %v345_v19 = vadd.f32 %v740_v18, %v701_v17  ;;  %v339_v20 = vpop.f32.mrb[1].mxu0 }
 0x19c   : > { %v340_v21 = vadd.f32 %v701_v17, %v339_v20 }
 0x19d   : > { %v349_v22 = vmax.f32 %v345_v19, 0.0 }
 0x19e   : > { %v348_v23 = vmax.f32 %v340_v21, 0.0 }
 0x1a0   : > { %v774_v24 = vpack.c.bf16 %v349_v22, %v348_v23 }
 0x1a2   : > { %775 = vmatprep.subr.bf16.mxu1 %v774_v24 }
 0x1a3   : > { %777 = vmatpush3.bf16.msra.mxu1 %v774_v24 }
 0x1a4   : > { %786 = vmatprep.subr.bf16.mxu1 %v949_v30 }
 0x1a6   : > { %746 = vmatmul.mubr.msk.f32.vlgmr.msra.gmra.mrb[0].mxu1 %vm266_vm0, %v231_v10 }
 0x1a7   : > { %788 = vmatpush3.bf16.msra.mxu1 %v787_v29  ;;  %767 = vmatprep.mubr.msk.f32.mxu1 %vm950_vm2, %v951_v34 }
 0x1a8   : > { %789 = vmatprep.subr.bf16.mxu1 %v949_v30 }
 0x1ab   : > { %791 = vmatpush3.bf16.msra.mxu1 %v790_v33 }
 0x279   : > { %v747_v25 = vpop.f32.mrb[0].mxu1 }
 0x27a   : > { %v416_v26 = vpop.f32.mrb[1].mxu1 }
 0x27b   : > { %756 = vmatprep.mubr.msk.f32.mxu0 %vm429_vm1, %v416_v26 }
 0x27c   : > { %757 = vmatmul.mubr.msk.f32.vlgmr.msra.gmra.mrb[2].mxu0 %vm429_vm1, %v747_v25 }
 0x34f   : > { %v758_v36 = vpop.f32.mrb[2].mxu0 }
 0x350   : > { %v508_v37 = vadd.f32 %v758_v36, %v706_v35  ;;  %v502_v38 = vpop.f32.mrb[3].mxu0 }
 0x351   : > { %v503_v39 = vadd.f32 %v706_v35, %v502_v38 }
 0x352   : > { %v512_v40 = vmax.f32 %v508_v37, 0.0 }
 0x353   : > { %v511_v41 = vmax.f32 %v503_v39, 0.0 }
 0x354   : > { %v514_v42 = vsel %vm429_vm1, %v512_v40, 0.0 }
 0x355   : > { %v513_v43 = vsel %vm429_vm1, %v511_v41, 0.0 }
 0x356   : > { %v515_v44 = vadd.f32 %v514_v42, %v513_v43 }
 0x358   : > { %v516_v45 = vrot.slane %v515_v44, 4 }
 0x35a   : > { %v517_v46 = vadd.f32 %v516_v45, %v515_v44 }
 0x35c   : > { %v518_v47 = vrot.slane %v517_v46, 2 }
 0x35e   : > { %v519_v48 = vadd.f32 %v518_v47, %v517_v46 }
 0x360   : > { %v520_v49 = vrot.slane %v519_v48, 1 }
 0x362   : > { %v521_v50 = vadd.f32 %v520_v49, %v519_v48 }
 0x364   : > { %v523_v51 = vmul.f32 0.0625, %v521_v50 }
 0x366   : > { %768 = vmatmul.mubr.msk.f32.vlgmr.msra.gmra.mrb[2].mxu1 %vm429_vm1, %v523_v51 }
 0x439   : > { %v593_v53 = vpop.f32.mrb[2].mxu1 }
 0x43a   : > { %v594_v54 = vadd.f32 %v593_v53, %v237_v52  ;;  %v769_v55 = vpop.f32.mrb[3].mxu1 }
 0x43c   : > { %597 = vst [vmem:[%s219_s28] sm:$0x1] %v594_v54 }
 0x43d   : > { %890 = shalt.err (!%p887_p7)
}
 0x43e   : > { %s891_s10 = scalar_lea.hbm %s1095_s27, 16  ;;  %s895_s13 = scalar_lea.hbm %s1141_s4, 64 }
 0x43f   : > { %p892_p8 = scmp.ne.s32.totalorder %s1095_s27, %s891_s10  ;;  %p896_p1 = scmp.lt.u32.totalorder %s1095_s27, %s1141_s4 }
 0x440   : > { %p897_p0 = scmp.lt.u32.totalorder %s895_s13, %s891_s10  ;;  %p899_p6 = scmp.lt.u32.totalorder %s891_s10, %s1095_s27 }
 0x441   : > { %p893_p11 = pnand %p892_p8, %p1152_p9 }
 0x442   : > { %p898_p5 = por %p897_p0, %p896_p1 }
 0x443   : > { %p894_p13 = pneg %p893_p11 }
 0x444   : > { %p900_p10 = por %p899_p6, %p898_p5 }
 0x446   : > { %p901_p12 = pnand %p900_p10, %p894_p13 }
 0x448   : > { %904 = shalt.err (!%p901_p12)
}
 0x449   : > { %796 = dma.vmem_to_hbm [thread:$0]  (%p1152_p9), %s1097_s30, 16, %s1095_s27, %s599_s6  }
 0x44a PF: > { %p808_p2 = scmp.ge.s32.totalorder %s943_s18, 2  ;;  %s623_s22 = sand.u32 1, %s931_s15  }
 0x44b   : > { %p1153_p3 = scmp.ne.s32.totalorder %s1146_s26, 0  ;;  %s624_s23 = scalar_lea.sflag [#allocation4], %s623_s22 }
 0x44d   : > { %p803_p4 = pnand %p808_p2, %p1153_p3 }
 0x44f   : > { %926 = dma.done.wait (!%p803_p4), %s624_s23, 16  }
 0x450   : > { %928 = vsyncadd (!%p803_p4), %s624_s23, 4294967280  ;;  %p15_p7 = scmp.ge.s32.totalorder %s1003_s21, 6   ;;  %s1154_s15 = smov %s935_s16 }
 0x451   : > { %s1155_s16 = smov %s939_s17  ;;  %s1156_s17 = smov %s1014_s24 }
 0x452   : > { %s1157_s18 = smov %s1003_s21  ;;  %17 = sbr.rel (!%p15_p7) target bundleno = 4 (0x4), region = 79 }
 0x459   :  { %628 = vsyncpa [#allocation3], 1 }
 0x45a   :  { %630 = vsyncpa [#allocation3 + $0x1], 1 }
 0x45b   :  { %631 = vsyncpa [#allocation4], 1 }
 0x45c   :  { %633 = vsyncpa [#allocation4 + $0x1], 1 }

</bundles_post_ra>
